<compile_context>
chip_gen: v7x
topology: tpu7x:2x2x1
jax: 0.10.0
libtpu: 0.0.40
codegen_flags: <defaults>
</compile_context>

<pallas_src>
import jax
import jax.numpy as jnp
from jax.experimental import pallas as pl
from jax.experimental.pallas import tpu as pltpu

_MAX_TILE_B = 1024  # review: sweep 512-2048; 1024 keeps intermediates tiny and tiles big


def _mlp_kernel(x_ref, w1_ref, b1_ref, w2_ref, b2_ref, w3_ref, b3_ref, o_ref):
    x = x_ref[...]                                                      # (TB, F)  f32 or bf16
    h1 = jnp.dot(x, w1_ref[...], preferred_element_type=jnp.float32)   # (TB, 64) f32 acc
    h1 = jnp.maximum(h1 + b1_ref[...], 0.0)                            # ReLU (f32)
    h2 = jnp.dot(h1, w2_ref[...], preferred_element_type=jnp.float32)  # (TB, 32)
    h2 = jnp.maximum(h2 + b2_ref[...], 0.0)                            # ReLU
    z = jnp.dot(h2, w3_ref[...], preferred_element_type=jnp.float32)   # (TB, 1)
    o_ref[...] = jax.nn.sigmoid(z + b3_ref[...])                       # Sigmoid


def _choose_tile_b(batch):
    if batch >= _MAX_TILE_B:
        return _MAX_TILE_B
    # Single (possibly partial) block: keep the sublane dim a multiple of 8.
    return max(8, ((batch + 7) // 8) * 8)


def ransomware_model_forward(x, params, *, bf16_stream=False):
    """x: (B, input_size). params: PyTorch-style nn.Linear parameters:
      w1 (64, F), b1 (64, 1), w2 (32, 64), b2 (32, 1), w3 (1, 32), b3 (1, 1).
    Returns (B, 1) float32, matching RansomwareModel.forward.
    If bf16_stream=True, x and w1 are streamed as bfloat16 (f32 accumulation)."""
    B, F = x.shape

    # Transpose the *small* weights once (x is left untouched in HBM).
    w1t = params["w1"].T.astype(jnp.float32)          # (F, 64)
    w2t = params["w2"].T.astype(jnp.float32)          # (64, 32)
    w3t = params["w3"].T.astype(jnp.float32)          # (32, 1)
    b1 = params["b1"].reshape(1, 64).astype(jnp.float32)
    b2 = params["b2"].reshape(1, 32).astype(jnp.float32)
    b3 = params["b3"].reshape(1, 1).astype(jnp.float32)

    if bf16_stream:
        x = x.astype(jnp.bfloat16)
        w1t = w1t.astype(jnp.bfloat16)
    else:
        x = x.astype(jnp.float32)

    tile_b = _choose_tile_b(B)
    n_tiles = pl.cdiv(B, tile_b)                       # ragged last block handled by Pallas

    const = lambda a: pl.BlockSpec(a.shape, lambda i: (0, 0))  # VMEM-resident across the grid

    weight_bytes = sum(int(a.size) * a.dtype.itemsize for a in (w1t, b1, w2t, b2, w3t, b3))
    cost = pl.CostEstimate(
        flops=2 * B * (F * 64 + 64 * 32 + 32 * 1),
        transcendentals=B,                              # sigmoid exp per output element
        bytes_accessed=int(x.size) * x.dtype.itemsize + 4 * B + weight_bytes,
    )

    out = pl.pallas_call(
        _mlp_kernel,
        out_shape=jax.ShapeDtypeStruct((B, 1), jnp.float32),
        grid=(n_tiles,),
        in_specs=[
            pl.BlockSpec((tile_b, F), lambda i: (i, 0)),   # contiguous batch-tile read of x
            const(w1t), const(b1), const(w2t), const(b2), const(w3t), const(b3),
        ],
        out_specs=pl.BlockSpec((tile_b, 1), lambda i: (i, 0)),
        compiler_params=pltpu.CompilerParams(
            dimension_semantics=("parallel",),             # megacore sharding when n_tiles >= 2
        ),
        cost_estimate=cost,
    )(x, w1t, b1, w2t, b2, w3t, b3)

    return out


def init_params(key, input_size):
    """Deterministic synthetic init mirroring nn.Linear ((out, in) weights, column biases)."""
    ks = jax.random.split(key, 6)

    def lin(kw, kb, fan_in, fan_out):
        bound = 1.0 / jnp.sqrt(fan_in)
        w = jax.random.uniform(kw, (fan_out, fan_in), jnp.float32, -bound, bound)
        b = jax.random.uniform(kb, (fan_out, 1), jnp.float32, -bound, bound)
        return w, b

    w1, b1 = lin(ks[0], ks[1], input_size, 64)
    w2, b2 = lin(ks[2], ks[3], 64, 32)
    w3, b3 = lin(ks[4], ks[5], 32, 1)
    return {"w1": w1, "b1": b1, "w2": w2, "b2": b2, "w3": w3, "b3": b3}


def _reference(x, p):
    h1 = jnp.maximum(x @ p["w1"].T + p["b1"].T, 0.0)
    h2 = jnp.maximum(h1 @ p["w2"].T + p["b2"].T, 0.0)
    return jax.nn.sigmoid(h2 @ p["w3"].T + p["b3"].T)


if __name__ == "__main__":
    key = jax.random.PRNGKey(0)
    k_x, k_p = jax.random.split(key)
    batch, input_size = 8, 32
    x = jax.random.normal(k_x, (batch, input_size), jnp.float32)
    params = init_params(k_p, input_size)

    out = ransomware_model_forward(x, params)
    out = jax.block_until_ready(out)

    ref = _reference(x, params)
    assert out.shape == (batch, 1)
    assert jnp.allclose(out, ref, atol=1e-5, rtol=1e-5)

    # Multi-tile + ragged last block (B not a multiple of TILE_B) to cover boundary handling.
    x2 = jax.random.normal(k_x, (2500, input_size), jnp.float32)
    out2 = jax.block_until_ready(ransomware_model_forward(x2, params))
    assert out2.shape == (2500, 1)
    assert jnp.allclose(out2, _reference(x2, params), atol=1e-5, rtol=1e-5)

    # bf16 HBM-stream path (halves x traffic on v5e/v6e/v7x); relaxed tolerance per review.
    out3 = jax.block_until_ready(ransomware_model_forward(x2, params, bf16_stream=True))
    assert out3.shape == (2500, 1)
    assert jnp.allclose(out3, _reference(x2, params), atol=1e-2, rtol=1e-2)

    print("KERNEL_OK")
</pallas_src>

<mosaic_0001>
module attributes {stable_mosaic.version = 11 : i64} {
  func.func @_mlp_kernel(%arg0: i32, %arg1: memref<8x32xf32, #tpu.memory_space<vmem>>, %arg2: memref<32x64xf32, #tpu.memory_space<vmem>>, %arg3: memref<1x64xf32, #tpu.memory_space<vmem>>, %arg4: memref<64x32xf32, #tpu.memory_space<vmem>>, %arg5: memref<1x32xf32, #tpu.memory_space<vmem>>, %arg6: memref<32x1xf32, #tpu.memory_space<vmem>>, %arg7: memref<1x1xf32, #tpu.memory_space<vmem>>, %arg8: memref<8x1xf32, #tpu.memory_space<vmem>>) attributes {dimension_semantics = [#tpu.dimension_semantics<parallel>], iteration_bounds = array<i64: 1>, scalar_prefetch = 0 : i64, scratch_operands = 0 : i64, tpu.core_type = #tpu.core_type<tc>, window_params = [{transform_indices = @transform_0, window_bounds = array<i64: 8, 32>}, {pipeline_mode = #tpu.pipeline_mode<synchronous>, transform_indices = @transform_1, window_bounds = array<i64: 32, 64>}, {pipeline_mode = #tpu.pipeline_mode<synchronous>, transform_indices = @transform_2, window_bounds = array<i64: 1, 64>}, {pipeline_mode = #tpu.pipeline_mode<synchronous>, transform_indices = @transform_3, window_bounds = array<i64: 64, 32>}, {pipeline_mode = #tpu.pipeline_mode<synchronous>, transform_indices = @transform_4, window_bounds = array<i64: 1, 32>}, {pipeline_mode = #tpu.pipeline_mode<synchronous>, transform_indices = @transform_5, window_bounds = array<i64: 32, 1>}, {pipeline_mode = #tpu.pipeline_mode<synchronous>, transform_indices = @transform_6, window_bounds = array<i64: 1, 1>}, {transform_indices = @transform_7, window_bounds = array<i64: 8, 1>}]} {
    %c0 = arith.constant 0 : index
    %c0_0 = arith.constant 0 : index
    %0 = vector.load %arg1[%c0, %c0_0] : memref<8x32xf32, #tpu.memory_space<vmem>>, vector<8x32xf32>
    %c0_1 = arith.constant 0 : index
    %c0_2 = arith.constant 0 : index
    %1 = vector.load %arg2[%c0_1, %c0_2] : memref<32x64xf32, #tpu.memory_space<vmem>>, vector<32x64xf32>
    %cst = arith.constant dense<0.000000e+00> : vector<8x64xf32>
    %2 = tpu.matmul %0, %1, %cst {dimension_numbers = #tpu.dot_dimension_numbers<[1], [0], [0], [1], [0, 0, 1, 1], [], []>} : vector<8x32xf32>, vector<32x64xf32>, vector<8x64xf32> -> vector<8x64xf32>
    %c0_3 = arith.constant 0 : index
    %c0_4 = arith.constant 0 : index
    %3 = vector.load %arg3[%c0_3, %c0_4] : memref<1x64xf32, #tpu.memory_space<vmem>>, vector<1x64xf32>
    %4 = vector.broadcast %3 : vector<1x64xf32> to vector<8x64xf32>
    %5 = arith.addf %2, %4 : vector<8x64xf32>
    %cst_5 = arith.constant 0.000000e+00 : f32
    %6 = vector.broadcast %cst_5 : f32 to vector<8x64xf32>
    %7 = arith.maximumf %5, %6 : vector<8x64xf32>
    %c0_6 = arith.constant 0 : index
    %c0_7 = arith.constant 0 : index
    %8 = vector.load %arg4[%c0_6, %c0_7] : memref<64x32xf32, #tpu.memory_space<vmem>>, vector<64x32xf32>
    %cst_8 = arith.constant dense<0.000000e+00> : vector<8x32xf32>
    %9 = tpu.matmul %7, %8, %cst_8 {dimension_numbers = #tpu.dot_dimension_numbers<[1], [0], [0], [1], [0, 0, 1, 1], [], []>} : vector<8x64xf32>, vector<64x32xf32>, vector<8x32xf32> -> vector<8x32xf32>
    %c0_9 = arith.constant 0 : index
    %c0_10 = arith.constant 0 : index
    %10 = vector.load %arg5[%c0_9, %c0_10] : memref<1x32xf32, #tpu.memory_space<vmem>>, vector<1x32xf32>
    %11 = vector.broadcast %10 : vector<1x32xf32> to vector<8x32xf32>
    %12 = arith.addf %9, %11 : vector<8x32xf32>
    %cst_11 = arith.constant 0.000000e+00 : f32
    %13 = vector.broadcast %cst_11 : f32 to vector<8x32xf32>
    %14 = arith.maximumf %12, %13 : vector<8x32xf32>
    %c0_12 = arith.constant 0 : index
    %c0_13 = arith.constant 0 : index
    %15 = vector.load %arg6[%c0_12, %c0_13] : memref<32x1xf32, #tpu.memory_space<vmem>>, vector<32x1xf32>
    %cst_14 = arith.constant dense<0.000000e+00> : vector<8x1xf32>
    %16 = tpu.matmul %14, %15, %cst_14 {dimension_numbers = #tpu.dot_dimension_numbers<[1], [0], [0], [1], [0, 0, 1, 1], [], []>} : vector<8x32xf32>, vector<32x1xf32>, vector<8x1xf32> -> vector<8x1xf32>
    %c0_15 = arith.constant 0 : index
    %c0_16 = arith.constant 0 : index
    %17 = vector.load %arg7[%c0_15, %c0_16] : memref<1x1xf32, #tpu.memory_space<vmem>>, vector<1x1xf32>
    %18 = vector.broadcast %17 : vector<1x1xf32> to vector<8x1xf32>
    %19 = arith.addf %16, %18 : vector<8x1xf32>
    %20 = arith.negf %19 : vector<8x1xf32>
    %21 = math.exp %20 : vector<8x1xf32>
    %cst_17 = arith.constant 1.000000e+00 : f32
    %22 = vector.broadcast %cst_17 : f32 to vector<8x1xf32>
    %23 = arith.addf %22, %21 : vector<8x1xf32>
    %24 = arith.divf %22, %23 : vector<8x1xf32>
    %c0_18 = arith.constant 0 : index
    %c0_19 = arith.constant 0 : index
    %25 = vector.load %arg8[%c0_18, %c0_19] : memref<8x1xf32, #tpu.memory_space<vmem>>, vector<8x1xf32>
    tpu.vector_store %arg8[%c0_18, %c0_19], %24 {strides = array<i32>} : memref<8x1xf32, #tpu.memory_space<vmem>>, vector<8x1xf32>,
    return
  }
  func.func @transform_0(%arg0: i32) -> (i32, i32) {
    %c0_i32 = arith.constant 0 : i32
    %c0_i32_0 = arith.constant 0 : i32
    return %arg0, %c0_i32 : i32, i32
  }
  func.func @transform_1(%arg0: i32) -> (i32, i32) {
    %c0_i32 = arith.constant 0 : i32
    %c0_i32_0 = arith.constant 0 : i32
    %c0_i32_1 = arith.constant 0 : i32
    return %c0_i32, %c0_i32_0 : i32, i32
  }
  func.func @transform_2(%arg0: i32) -> (i32, i32) {
    %c0_i32 = arith.constant 0 : i32
    %c0_i32_0 = arith.constant 0 : i32
    %c0_i32_1 = arith.constant 0 : i32
    return %c0_i32, %c0_i32_0 : i32, i32
  }
  func.func @transform_3(%arg0: i32) -> (i32, i32) {
    %c0_i32 = arith.constant 0 : i32
    %c0_i32_0 = arith.constant 0 : i32
    %c0_i32_1 = arith.constant 0 : i32
    return %c0_i32, %c0_i32_0 : i32, i32
  }
  func.func @transform_4(%arg0: i32) -> (i32, i32) {
    %c0_i32 = arith.constant 0 : i32
    %c0_i32_0 = arith.constant 0 : i32
    %c0_i32_1 = arith.constant 0 : i32
    return %c0_i32, %c0_i32_0 : i32, i32
  }
  func.func @transform_5(%arg0: i32) -> (i32, i32) {
    %c0_i32 = arith.constant 0 : i32
    %c0_i32_0 = arith.constant 0 : i32
    %c0_i32_1 = arith.constant 0 : i32
    return %c0_i32, %c0_i32_0 : i32, i32
  }
  func.func @transform_6(%arg0: i32) -> (i32, i32) {
    %c0_i32 = arith.constant 0 : i32
    %c0_i32_0 = arith.constant 0 : i32
    %c0_i32_1 = arith.constant 0 : i32
    return %c0_i32, %c0_i32_0 : i32, i32
  }
  func.func @transform_7(%arg0: i32) -> (i32, i32) {
    %c0_i32 = arith.constant 0 : i32
    %c0_i32_0 = arith.constant 0 : i32
    return %arg0, %c0_i32 : i32, i32
  }
}

</mosaic_0001>

<bundles_post_ra>
// kernel: tpu_custom_call.1
= control target key start
LH: loop header
LB: loop body
LE: loop exit
PB: predicated region body
PF: predicated region fallthrough
CT: control target
= control target key end

     0   :  { %v399_v0 = vmov 0.0|0.0   ;;  %vm400_vm0 = vmmov 0   ;;  %v401_v4 = vmov 0.0   ;;  %vm40_vm1 = vcmask 261120   ;;  %s510_s1 = inlined_call_operand.vmem [shape: f32[32,64], index: 1, kind: input, shape index: {}]   ;;  %s511_s3 = inlined_call_operand.vmem [shape: f32[64,32], index: 3, kind: input, shape index: {}]   ;;  %s512_s0 = inlined_call_operand.vmem [shape: f32[8,32], index: 0, kind: input, shape index: {}]   ;;  %s513_s5 = inlined_call_operand.vmem [shape: f32[32,1], index: 5, kind: input, shape index: {}]   ;;  %s514_s2 = inlined_call_operand.vmem [shape: f32[1,64], index: 2, kind: input, shape index: {}]   ;;  %s515_s6 = inlined_call_operand.<no memory space> [shape: f32[1,1], index: 6, kind: input, shape index: {}]   ;;  %s516_s4 = inlined_call_operand.vmem [shape: f32[1,32], index: 4, kind: input, shape index: {}]   ;;  %s517_s7 = inlined_call_operand.vmem [shape: f32[8,1], index: 7, kind: output, shape index: {}]  }
   0x1   :  { %368 = vmatprep.subr.bf16.mxu0 %v399_v0  ;;  %v29_v1 = vld [vmem:[%s510_s1] sm:$0xff]  ;;  %v30_v2 = vld [vmem:[%s510_s1 + $0x8] sm:$0xff]  ;;  %v31_v3 = vld [vmem:[%s510_s1 + $0x10] sm:$0xff]  ;;  %335 = vmatprep.mubr.msk.f32.mxu0 %vm400_vm0, %v401_v4  ;;  %vm130_vm2 = vcmask 523264   ;;  %v12_v32 = vstv %s515_s6  ;;  %vm295_vm3 = vcmask 7168  }
   0x2   :  { %v369_v5 = vpack.c.bf16 %v30_v2, %v29_v1  ;;  %v32_v6 = vld [vmem:[%s510_s1 + $0x18] sm:$0xff]  ;;  %374 = vmatprep.subr.bf16.mxu1 %v399_v0  ;;  %v115_v7 = vld [vmem:[%s511_s3] sm:$0xff]  ;;  %354 = vmatprep.mubr.msk.f32.mxu1 %vm400_vm0, %v401_v4  ;;  %v116_v8 = vld [vmem:[%s511_s3 + $0x8] sm:$0xff]  ;;  %13 = vst [vmem:[#allocation2] sm:$0x1] %v12_v32 }
   0x3   :  { %v117_v9 = vld [vmem:[%s511_s3 + $0x10] sm:$0xff]  ;;  %v118_v10 = vld [vmem:[%s511_s3 + $0x18] sm:$0xff]  ;;  %v372_v11 = vpack.c.bf16 %v32_v6, %v31_v3  ;;  %v375_v12 = vpack.c.bf16 %v116_v8, %v115_v7  ;;  %v119_v14 = vld [vmem:[%s511_s3 + $0x20] sm:$0xff] }
   0x4   :  { %370 = vmatpush3.bf16.msra.mxu0 %v369_v5  ;;  %v378_v13 = vpack.c.bf16 %v118_v10, %v117_v9  ;;  %v120_v15 = vld [vmem:[%s511_s3 + $0x28] sm:$0xff]  ;;  %v28_v16 = vld [vmem:[%s512_s0] sm:$0xff]  ;;  %v121_v18 = vld [vmem:[%s511_s3 + $0x30] sm:$0xff] }
   0x5   :  { %371 = vmatprep.subr.bf16.mxu0 %v399_v0  ;;  %376 = vmatpush3.bf16.msra.mxu1 %v375_v12  ;;  %v381_v17 = vpack.c.bf16 %v120_v15, %v119_v14  ;;  %v122_v19 = vld [vmem:[%s511_s3 + $0x38] sm:$0xff]  ;;  %v205_v21 = vld [vmem:[%s513_s5] sm:$0xff]  ;;  %v206_v22 = vld [vmem:[%s513_s5 + $0x8] sm:$0xff] }
   0x6   :  { %377 = vmatprep.subr.bf16.mxu1 %v399_v0  ;;  %v384_v20 = vpack.c.bf16 %v122_v19, %v121_v18  ;;  %v387_v23 = vpack.c.bf16 %v206_v22, %v205_v21  ;;  %v301_v24 = vld [vmem:[%s514_s2] ss:$0 sm:$0xff]  ;;  %v207_v29 = vld [vmem:[%s513_s5 + $0x10] sm:$0xff]  ;;  %v208_v30 = vld [vmem:[%s513_s5 + $0x18] sm:$0xff] }
   0x7   :  { %v390_v31 = vpack.c.bf16 %v208_v30, %v207_v29  ;;  %v303_v33 = vld [vmem:[%s516_s4] ss:$0 sm:$0xff] }
   0x8   :  { %373 = vmatpush3.bf16.msra.mxu0 %v372_v11 }
   0x9   :  { %386 = vmatprep.subr.bf16.mxu0 %v399_v0  ;;  %379 = vmatpush3.bf16.msra.mxu1 %v378_v13  ;;  %v305_v38 = vld [vmem:[#allocation2] ss:$0 sm:$0xff] }
   0xa   :  { %380 = vmatprep.subr.bf16.mxu1 %v399_v0 }
   0xb   :  { %336 = vmatmul.mubr.msk.f32.vlgmr.msra.gmra.mrb[0].mxu0 %vm40_vm1, %v28_v16 }
   0xc   :  { %365 = vmatprep.mubr.msk.f32.mxu0 %vm400_vm0, %v401_v4  ;;  %388 = vmatpush3.bf16.msra.mxu0 %v387_v23 }
   0xd   :  { %382 = vmatpush3.bf16.msra.mxu1 %v381_v17  ;;  %389 = vmatprep.subr.bf16.mxu0 %v399_v0 }
   0xe   :  { %383 = vmatprep.subr.bf16.mxu1 %v399_v0 }
  0x10   :  { %391 = vmatpush3.bf16.msra.mxu0 %v390_v31 }
  0x11   :  { %385 = vmatpush3.bf16.msra.mxu1 %v384_v20 }
  0xde   :  { %v110_v25 = vpop.f32.mrb[0].mxu0 }
  0xdf   :  { %v111_v26 = vadd.f32 %v301_v24, %v110_v25  ;;  %v337_v27 = vpop.f32.mrb[1].mxu0 }
  0xe1   :  { %v114_v28 = vmax.f32 %v111_v26, 0.0 }
  0xe3   :  { %355 = vmatmul.mubr.msk.f32.vlgmr.msra.gmra.mrb[0].mxu1 %vm130_vm2, %v114_v28 }
 0x1b6   :  { %v200_v34 = vpop.f32.mrb[0].mxu1 }
 0x1b7   :  { %v201_v35 = vadd.f32 %v303_v33, %v200_v34  ;;  %v356_v36 = vpop.f32.mrb[1].mxu1 }
 0x1b9   :  { %v204_v37 = vmax.f32 %v201_v35, 0.0 }
 0x1bb   :  { %366 = vmatmul.mubr.msk.f32.vlgmr.msra.gmra.mrb[2].mxu0 %vm40_vm1, %v204_v37 }
 0x28e   :  { %v285_v39 = vpop.f32.mrb[2].mxu0 }
 0x28f   :  { %v286_v40 = vadd.f32 %v305_v38, %v285_v39  ;;  %v367_v41 = vpop.f32.mrb[3].mxu0 }
 0x291   :  { %v307_v42 = vmul.f32 -1.442695, %v286_v40 }
 0x293   :  { %395 = vpow2.f32 %v307_v42 }
 0x29d   :  { %v396_v43 = vpop.eup %395 }
 0x29e   :  { %v292_v44 = vadd.f32 1.0, %v396_v43 }
 0x2a0   :  { %397 = vrcp.f32 %v292_v44 }
 0x2aa   :  { %v398_v45 = vpop.eup %397 }
 0x2ab   :  { %296 = vst.msk [vmem:[%s517_s7] sm:$0xff] %vm295_vm3, %v398_v45 }

</bundles_post_ra>
